<compile_context>
chip_gen: v7x
topology: tpu7x:2x2x1
jax: 0.10.0
libtpu: 0.0.40
codegen_flags: <defaults>
</compile_context>

<pallas_src>
import jax
import jax.numpy as jnp
import numpy as np
from jax.experimental import pallas as pl
from jax.experimental.pallas import tpu as pltpu

FPH_DIM = 8          # chunk size used by torch.split(x, FPH_DIM, dim=3)
BN_EPS = 1e-5


def _make_kernel(n_layers, has_y, n_splits, c_last):
    """One row-tile: fused block-diagonal MLP + max over the S split groups."""
    def kernel(*refs):
        o_ref = refs[-1]
        if has_y:
            x_ref, y_ref = refs[0], refs[1]
            params = refs[2:-1]
        else:
            x_ref, y_ref = refs[0], None
            params = refs[1:-1]

        # ---- layer 1: block-diag x-matmul (+ shared y-matmul, done once) ----
        h = jnp.dot(x_ref[...], params[0][...],
                    preferred_element_type=jnp.float32)
        p = 1
        if has_y:
            h = h + jnp.dot(y_ref[...], params[1][...],
                            preferred_element_type=jnp.float32)
            p = 2
        h = jnp.maximum(h + params[p][...], 0.0)        # folded-BN bias + ReLU
        p += 1

        # ---- layers 2..n: one block-diagonal matmul each ----
        for _ in range(n_layers - 1):
            w = params[p][...]
            b = params[p + 1][...]
            p += 2
            h = jnp.dot(h.astype(w.dtype), w,
                        preferred_element_type=jnp.float32)
            h = jnp.maximum(h + b, 0.0)

        # ---- max over the S split groups (column groups of width c_last) ----
        out = h[:, 0:c_last]
        for s in range(1, n_splits):
            out = jnp.maximum(out, h[:, s * c_last:(s + 1) * c_last])
        o_ref[...] = out.astype(o_ref.dtype)

    return kernel


def _pick_tile(L, tile_l):
    """Large row tiles for HBM efficiency; keep >=2 grid steps when possible."""
    if L <= 8:
        return L
    tl = max(8, (min(tile_l, L) // 8) * 8)
    if -(-L // tl) < 2 and L >= 16:        # give megacore at least 2 steps
        tl = max(8, ((L // 2) // 8) * 8)
    return tl


def feature_transformation_3d(x, y, weights, bn_params, tile_l=1024):
    """x: (B, A, N, S*FPH_DIM), y: (B, A, N, Fy) or None.

    weights[i]: Conv3d weight (C_out_i, C_in_i) (1x1x1 kernel squeezed).
    bn_params[i]: (gamma, beta, running_mean, running_var), each (C_out_i,).
    Returns (B, A, N, C_last), matching the PyTorch module output.
    """
    B, A, N, Ftot = x.shape
    assert Ftot % FPH_DIM == 0
    S = Ftot // FPH_DIM
    L = B * A * N
    has_y = y is not None
    compute_dtype = jnp.bfloat16

    # ---- inputs: flat 2-D row-major, channels on lanes, bf16 for the MXU ----
    inputs = [x.reshape(L, Ftot).astype(compute_dtype)]
    if has_y:
        Fy = y.shape[-1]
        inputs.append(y.reshape(L, Fy).astype(compute_dtype))

    # ---- fold BN scale into the weights; build block-diagonal params ----
    eye_s = jnp.eye(S, dtype=jnp.float32)
    params = []
    c_prev = FPH_DIM + (y.shape[-1] if has_y else 0)
    for li, (W, (gamma, beta, mean, var)) in enumerate(zip(weights, bn_params)):
        c_out, c_in_w = W.shape
        assert c_in_w == c_prev
        scale = gamma / jnp.sqrt(var + BN_EPS)
        bias = beta - mean * scale
        Wt = (W.T.astype(jnp.float32) * scale[None, :])          # (c_in, c_out)
        if li == 0:
            Wx = Wt[:FPH_DIM, :]
            params.append(jnp.kron(eye_s, Wx).astype(compute_dtype))      # (S*FPH, S*c_out)
            if has_y:
                Wy = Wt[FPH_DIM:, :]
                params.append(jnp.tile(Wy, (1, S)).astype(compute_dtype))  # (Fy, S*c_out)
        else:
            params.append(jnp.kron(eye_s, Wt).astype(compute_dtype))       # (S*c_prev, S*c_out)
        params.append(jnp.tile(bias, S).reshape(1, S * c_out).astype(jnp.float32))
        c_prev = c_out
    c_last = c_prev
    n_layers = len(weights)

    # ---- tiling: pad rows to a multiple of the tile ----
    TL = _pick_tile(L, tile_l)
    num_tiles = -(-L // TL)
    L_pad = num_tiles * TL
    if L_pad != L:
        pad = L_pad - L
        inputs = [jnp.pad(a, ((0, pad), (0, 0))) for a in inputs]

    in_specs = [pl.BlockSpec((TL, inputs[0].shape[1]), lambda i: (i, 0))]
    if has_y:
        in_specs.append(pl.BlockSpec((TL, inputs[1].shape[1]), lambda i: (i, 0)))
    for prm in params:
        in_specs.append(pl.BlockSpec(prm.shape, lambda i: (0, 0)))  # resident weights

    out = pl.pallas_call(
        _make_kernel(n_layers, has_y, S, c_last),
        grid=(num_tiles,),
        in_specs=in_specs,
        out_specs=pl.BlockSpec((TL, c_last), lambda i: (i, 0)),
        out_shape=jax.ShapeDtypeStruct((L_pad, c_last), jnp.float32),
        compiler_params=pltpu.CompilerParams(dimension_semantics=("parallel",)),
    )(*inputs, *params)

    return out[:L].reshape(B, A, N, c_last)


def reference(x, y, weights, bn_params):
    """Pure-JAX (f32) mirror of the PyTorch forward (BN in eval mode)."""
    B, A, N, Ftot = x.shape
    S = Ftot // FPH_DIM
    x1 = jnp.stack(jnp.split(x, S, axis=3), axis=4)          # (B,A,N,FPH,S)
    if y is not None:
        y1 = jnp.repeat(y[..., None], S, axis=4)             # (B,A,N,Fy,S)
        x3 = jnp.concatenate([x1, y1], axis=3)
    else:
        x3 = x1
    x3 = jnp.transpose(x3, (0, 3, 2, 1, 4))                  # (B,C,N,A,S)
    for W, (gamma, beta, mean, var) in zip(weights, bn_params):
        x3 = jnp.einsum("oc,bcnas->bonas", W, x3)            # 1x1x1 Conv3d
        scale = gamma / jnp.sqrt(var + BN_EPS)
        bias = beta - mean * scale
        x3 = jax.nn.relu(x3 * scale[None, :, None, None, None]
                         + bias[None, :, None, None, None])
    x3 = x3.max(axis=-1)                                     # (B,C,N,A)
    return jnp.swapaxes(x3, 3, 1)                            # (B,A,N,C)


if __name__ == "__main__":
    key = jax.random.PRNGKey(0)
    B, A, N = 2, 4, 16
    S = 4
    Ftot = FPH_DIM * S          # 32
    Fy = 8
    in_channel = FPH_DIM + Fy   # 16
    mlp = [32, 64]

    keys = jax.random.split(key, 2 + 4 * len(mlp))
    x = jax.random.normal(keys[0], (B, A, N, Ftot), dtype=jnp.float32)
    y = jax.random.normal(keys[1], (B, A, N, Fy), dtype=jnp.float32)

    weights, bn_params = [], []
    c_prev = in_channel
    ki = 2
    for c_out in mlp:
        W = 0.1 * jax.random.normal(keys[ki], (c_out, c_prev), dtype=jnp.float32); ki += 1
        gamma = 1.0 + 0.1 * jax.random.normal(keys[ki], (c_out,), dtype=jnp.float32); ki += 1
        beta = 0.1 * jax.random.normal(keys[ki], (c_out,), dtype=jnp.float32); ki += 1
        mv = jax.random.normal(keys[ki], (c_out,), dtype=jnp.float32); ki += 1
        mean = 0.1 * mv
        var = jnp.abs(mv) + 0.5
        weights.append(W)
        bn_params.append((gamma, beta, mean, var))
        c_prev = c_out

    out = feature_transformation_3d(x, y, weights, bn_params)
    out = jax.block_until_ready(out)

    ref = reference(x, y, weights, bn_params)
    # bf16 MXU operands (K <= 128): allow ~1e-2 tolerance vs the f32 reference.
    np.testing.assert_allclose(np.asarray(out), np.asarray(ref), rtol=1e-2, atol=1e-2)
    print("KERNEL_OK")
</pallas_src>

<mosaic_0001>
module attributes {stable_mosaic.version = 11 : i64} {
  func.func @kernel(%arg0: i32, %arg1: memref<64x32xbf16, #tpu.memory_space<vmem>>, %arg2: memref<64x8xbf16, #tpu.memory_space<vmem>>, %arg3: memref<32x128xbf16, #tpu.memory_space<vmem>>, %arg4: memref<8x128xbf16, #tpu.memory_space<vmem>>, %arg5: memref<1x128xf32, #tpu.memory_space<vmem>>, %arg6: memref<128x256xbf16, #tpu.memory_space<vmem>>, %arg7: memref<1x256xf32, #tpu.memory_space<vmem>>, %arg8: memref<64x64xf32, #tpu.memory_space<vmem>>) attributes {dimension_semantics = [#tpu.dimension_semantics<parallel>], iteration_bounds = array<i64: 2>, scalar_prefetch = 0 : i64, scratch_operands = 0 : i64, tpu.core_type = #tpu.core_type<tc>, window_params = [{transform_indices = @transform_0, window_bounds = array<i64: 64, 32>}, {transform_indices = @transform_1, window_bounds = array<i64: 64, 8>}, {pipeline_mode = #tpu.pipeline_mode<synchronous>, transform_indices = @transform_2, window_bounds = array<i64: 32, 128>}, {pipeline_mode = #tpu.pipeline_mode<synchronous>, transform_indices = @transform_3, window_bounds = array<i64: 8, 128>}, {pipeline_mode = #tpu.pipeline_mode<synchronous>, transform_indices = @transform_4, window_bounds = array<i64: 1, 128>}, {pipeline_mode = #tpu.pipeline_mode<synchronous>, transform_indices = @transform_5, window_bounds = array<i64: 128, 256>}, {pipeline_mode = #tpu.pipeline_mode<synchronous>, transform_indices = @transform_6, window_bounds = array<i64: 1, 256>}, {transform_indices = @transform_7, window_bounds = array<i64: 64, 64>}]} {
    %c0 = arith.constant 0 : index
    %c0_0 = arith.constant 0 : index
    %0 = vector.load %arg1[%c0, %c0_0] : memref<64x32xbf16, #tpu.memory_space<vmem>>, vector<64x32xbf16>
    %c0_1 = arith.constant 0 : index
    %c0_2 = arith.constant 0 : index
    %1 = vector.load %arg3[%c0_1, %c0_2] : memref<32x128xbf16, #tpu.memory_space<vmem>>, vector<32x128xbf16>
    %cst = arith.constant dense<0.000000e+00> : vector<64x128xf32>
    %2 = tpu.matmul %0, %1, %cst {dimension_numbers = #tpu.dot_dimension_numbers<[1], [0], [0], [1], [0, 0, 1, 1], [], []>} : vector<64x32xbf16>, vector<32x128xbf16>, vector<64x128xf32> -> vector<64x128xf32>
    %c0_3 = arith.constant 0 : index
    %c0_4 = arith.constant 0 : index
    %3 = vector.load %arg2[%c0_3, %c0_4] : memref<64x8xbf16, #tpu.memory_space<vmem>>, vector<64x8xbf16>
    %c0_5 = arith.constant 0 : index
    %c0_6 = arith.constant 0 : index
    %4 = vector.load %arg4[%c0_5, %c0_6] : memref<8x128xbf16, #tpu.memory_space<vmem>>, vector<8x128xbf16>
    %cst_7 = arith.constant dense<0.000000e+00> : vector<64x128xf32>
    %5 = tpu.matmul %3, %4, %cst_7 {dimension_numbers = #tpu.dot_dimension_numbers<[1], [0], [0], [1], [0, 0, 1, 1], [], []>} : vector<64x8xbf16>, vector<8x128xbf16>, vector<64x128xf32> -> vector<64x128xf32>
    %6 = arith.addf %2, %5 : vector<64x128xf32>
    %c0_8 = arith.constant 0 : index
    %c0_9 = arith.constant 0 : index
    %7 = vector.load %arg5[%c0_8, %c0_9] : memref<1x128xf32, #tpu.memory_space<vmem>>, vector<1x128xf32>
    %8 = vector.broadcast %7 : vector<1x128xf32> to vector<64x128xf32>
    %9 = arith.addf %6, %8 : vector<64x128xf32>
    %cst_10 = arith.constant 0.000000e+00 : f32
    %10 = vector.broadcast %cst_10 : f32 to vector<64x128xf32>
    %11 = arith.maximumf %9, %10 : vector<64x128xf32>
    %c0_11 = arith.constant 0 : index
    %c0_12 = arith.constant 0 : index
    %12 = vector.load %arg6[%c0_11, %c0_12] : memref<128x256xbf16, #tpu.memory_space<vmem>>, vector<128x256xbf16>
    %c0_13 = arith.constant 0 : index
    %c0_14 = arith.constant 0 : index
    %13 = vector.load %arg7[%c0_13, %c0_14] : memref<1x256xf32, #tpu.memory_space<vmem>>, vector<1x256xf32>
    %14 = arith.truncf %11 : vector<64x128xf32> to vector<64x128xbf16>
    %cst_15 = arith.constant dense<0.000000e+00> : vector<64x256xf32>
    %15 = tpu.matmul %14, %12, %cst_15 {dimension_numbers = #tpu.dot_dimension_numbers<[1], [0], [0], [1], [0, 0, 1, 1], [], []>} : vector<64x128xbf16>, vector<128x256xbf16>, vector<64x256xf32> -> vector<64x256xf32>
    %16 = vector.broadcast %13 : vector<1x256xf32> to vector<64x256xf32>
    %17 = arith.addf %15, %16 : vector<64x256xf32>
    %cst_16 = arith.constant 0.000000e+00 : f32
    %18 = vector.broadcast %cst_16 : f32 to vector<64x256xf32>
    %19 = arith.maximumf %17, %18 : vector<64x256xf32>
    %20 = vector.extract_strided_slice %19 {offsets = [0, 0], sizes = [64, 64], strides = [1, 1]} : vector<64x256xf32> to vector<64x64xf32>
    %21 = vector.extract_strided_slice %19 {offsets = [0, 64], sizes = [64, 64], strides = [1, 1]} : vector<64x256xf32> to vector<64x64xf32>
    %22 = arith.maximumf %20, %21 : vector<64x64xf32>
    %23 = vector.extract_strided_slice %19 {offsets = [0, 128], sizes = [64, 64], strides = [1, 1]} : vector<64x256xf32> to vector<64x64xf32>
    %24 = arith.maximumf %22, %23 : vector<64x64xf32>
    %25 = vector.extract_strided_slice %19 {offsets = [0, 192], sizes = [64, 64], strides = [1, 1]} : vector<64x256xf32> to vector<64x64xf32>
    %26 = arith.maximumf %24, %25 : vector<64x64xf32>
    %c0_17 = arith.constant 0 : index
    %c0_18 = arith.constant 0 : index
    %27 = vector.load %arg8[%c0_17, %c0_18] : memref<64x64xf32, #tpu.memory_space<vmem>>, vector<64x64xf32>
    tpu.vector_store %arg8[%c0_17, %c0_18], %26 {strides = array<i32>} : memref<64x64xf32, #tpu.memory_space<vmem>>, vector<64x64xf32>,
    return
  }
  func.func @transform_0(%arg0: i32) -> (i32, i32) {
    %c0_i32 = arith.constant 0 : i32
    %c0_i32_0 = arith.constant 0 : i32
    return %arg0, %c0_i32 : i32, i32
  }
  func.func @transform_1(%arg0: i32) -> (i32, i32) {
    %c0_i32 = arith.constant 0 : i32
    %c0_i32_0 = arith.constant 0 : i32
    return %arg0, %c0_i32 : i32, i32
  }
  func.func @transform_2(%arg0: i32) -> (i32, i32) {
    %c0_i32 = arith.constant 0 : i32
    %c0_i32_0 = arith.constant 0 : i32
    %c0_i32_1 = arith.constant 0 : i32
    return %c0_i32, %c0_i32_0 : i32, i32
  }
  func.func @transform_3(%arg0: i32) -> (i32, i32) {
    %c0_i32 = arith.constant 0 : i32
    %c0_i32_0 = arith.constant 0 : i32
    %c0_i32_1 = arith.constant 0 : i32
    return %c0_i32, %c0_i32_0 : i32, i32
  }
  func.func @transform_4(%arg0: i32) -> (i32, i32) {
    %c0_i32 = arith.constant 0 : i32
    %c0_i32_0 = arith.constant 0 : i32
    %c0_i32_1 = arith.constant 0 : i32
    return %c0_i32, %c0_i32_0 : i32, i32
  }
  func.func @transform_5(%arg0: i32) -> (i32, i32) {
    %c0_i32 = arith.constant 0 : i32
    %c0_i32_0 = arith.constant 0 : i32
    %c0_i32_1 = arith.constant 0 : i32
    return %c0_i32, %c0_i32_0 : i32, i32
  }
  func.func @transform_6(%arg0: i32) -> (i32, i32) {
    %c0_i32 = arith.constant 0 : i32
    %c0_i32_0 = arith.constant 0 : i32
    %c0_i32_1 = arith.constant 0 : i32
    return %c0_i32, %c0_i32_0 : i32, i32
  }
  func.func @transform_7(%arg0: i32) -> (i32, i32) {
    %c0_i32 = arith.constant 0 : i32
    %c0_i32_0 = arith.constant 0 : i32
    return %arg0, %c0_i32 : i32, i32
  }
}

</mosaic_0001>

<bundles_post_ra>
// kernel: tpu_custom_call.1
= control target key start
LH: loop header
LB: loop body
LE: loop exit
PB: predicated region body
PF: predicated region fallthrough
CT: control target
= control target key end

     0   :  { %s1111_s24 = smov 0   ;;  %s1271_s0 = inlined_call_operand.vmem [shape: bf16[128,32], index: 0, kind: input, shape index: {}]   ;;  %s1272_s1 = inlined_call_operand.vmem [shape: bf16[128,8], index: 1, kind: input, shape index: {}]   ;;  %s1273_s2 = inlined_call_operand.vmem [shape: bf16[32,128], index: 2, kind: input, shape index: {}]   ;;  %s1274_s3 = inlined_call_operand.vmem [shape: bf16[8,128], index: 3, kind: input, shape index: {}]   ;;  %s1275_s4 = inlined_call_operand.vmem [shape: f32[1,128], index: 4, kind: input, shape index: {}]   ;;  %s1276_s5 = inlined_call_operand.vmem [shape: bf16[128,256], index: 5, kind: input, shape index: {}]   ;;  %s1277_s6 = inlined_call_operand.vmem [shape: f32[1,256], index: 6, kind: input, shape index: {}]   ;;  %s1278_s7 = inlined_call_operand.vmem [shape: f32[128,64], index: 7, kind: output, shape index: {}]  }
   0x1 LB: > { %s927_s25 = sadd.s32 4294967295, %s1067_s24   ;;  %p931_p0 = scmp.ge.s32.totalorder %s1067_s24, 1  ;;  %s1067_s24 = sphi %s1111_s24, %s17_s24  }
   0x2   : > { %p249_p1 = scmp.lt.s32.totalorder %s1067_s24, 3 }
   0x4   : > { %p250_p2 = pnand %p931_p0, %p249_p1 }
   0x5   : > { %v325_v0 = vld [vmem:[%s1274_s3] sm:$0xf] (!%p250_p2)  ;;  %vm359_vm0 = vcmask (!%p250_p2), 1043456   ;;  %s932_s28 = sshll.u32 (!%p250_p2), %s927_s25, 3  ;;  %v1037_v3 = vld [vmem:[%s1276_s5 + $0x4] ss:$8 sps:$4 sm:$0xff] (!%p250_p2)   ;;  %v583_v58 = vlaneseq (!%p250_p2) }
   0x6   : > { %253 = sbr.rel (%p250_p2) target bundleno = 621 (0x26d), region = 48  ;;  %v1028_v1 = vld [vmem:[%s1273_s2] sm:$0xff] (!%p250_p2)   ;;  %1016 = vmatprep.subr.msk.bf16.mxu0 (!%p250_p2), %vm359_vm0, %v325_v0  ;;  %v361_v2 = vsel (!%p250_p2), %vm359_vm0, %v325_v0, 0  ;;  %p287_p3 = scmp.lt.s32.totalorder (!%p250_p2), %s932_s28, 15  ;;  %673 = vmatprep.subr.bf16.mxu1 (!%p250_p2), %v1037_v3  ;;  %v1040_v5 = vld [vmem:[%s1276_s5 + $0x14] ss:$8 sps:$4 sm:$0xff] (!%p250_p2)  }
   0x7   : > { %987 = vmatpush3.bf16.msra.mxu0 (!%p250_p2), %v361_v2  ;;  %v1039_v4 = vld [vmem:[%s1276_s5] ss:$8 sps:$4 sm:$0xff] (!%p250_p2)   ;;  %vm346_vm1 = vcmask (!%p250_p2), 64512   ;;  %v1042_v7 = vld [vmem:[%s1276_s5 + $0x10] ss:$8 sps:$4 sm:$0xff] (!%p250_p2)   ;;  %vm460_vm2 = vcmask (!%p250_p2), 261120  }
   0x8   : > { %996 = vmatprep.subr.bf16.mxu0 (!%p250_p2), %v1028_v1  ;;  %v1031_v6 = vld [vmem:[%s1273_s2 + $0x8] sm:$0xff] (!%p250_p2)   ;;  %674 = vmatpush1.bf16.msra.mxu1 (!%p250_p2), %v1039_v4  ;;  %v1046_v15 = vld [vmem:[%s1276_s5 + $0x34] ss:$8 sps:$4 sm:$0xff] (!%p250_p2)   ;;  %v1048_v16 = vld [vmem:[%s1276_s5 + $0x30] ss:$8 sps:$4 sm:$0xff] (!%p250_p2)   ;;  %v1069_v28 = vmov (!%p250_p2), 0  }
   0x9   : > { %v1043_v8 = vld [vmem:[%s1276_s5 + $0x24] ss:$8 sps:$4 sm:$0xff] (!%p250_p2)   ;;  %675 = vmatprep.subr.bf16.mxu1 (!%p250_p2), %v1040_v5  ;;  %v1045_v12 = vld [vmem:[%s1276_s5 + $0x20] ss:$8 sps:$4 sm:$0xff] (!%p250_p2)   ;;  %v1052_v19 = vld [vmem:[%s1276_s5 + $0x54] ss:$8 sps:$4 sm:$0xff] (!%p250_p2)   ;;  %705 = vmatprep.mubr.bf16.mxu1 (!%p250_p2), %v1069_v28 }
   0xa   : > { %v1049_v17 = vld [vmem:[%s1276_s5 + $0x44] ss:$8 sps:$4 sm:$0xff] (!%p250_p2)   ;;  %v1051_v18 = vld [vmem:[%s1276_s5 + $0x40] ss:$8 sps:$4 sm:$0xff] (!%p250_p2)   ;;  %v1054_v21 = vld [vmem:[%s1276_s5 + $0x50] ss:$8 sps:$4 sm:$0xff] (!%p250_p2)  }
   0xb   : > { %v1055_v24 = vld [vmem:[%s1276_s5 + $0x64] ss:$8 sps:$4 sm:$0xff] (!%p250_p2)   ;;  %v1057_v25 = vld [vmem:[%s1276_s5 + $0x60] ss:$8 sps:$4 sm:$0xff] (!%p250_p2)   ;;  %v1058_v26 = vld [vmem:[%s1276_s5 + $0x74] ss:$8 sps:$4 sm:$0xff] (!%p250_p2)  }
   0xc   : > { %676 = vmatpush1.bf16.msra.mxu1 (!%p250_p2), %v1042_v7  ;;  %v1060_v27 = vld [vmem:[%s1276_s5 + $0x70] ss:$8 sps:$4 sm:$0xff] (!%p250_p2)   ;;  %v956_v29 = vld [vmem:[%s1275_s4] ss:$0 sm:$0xff] (!%p250_p2)  ;;  %v584_v59 = vshrl.u32 (!%p250_p2), %v583_v58, 7  ;;  %s1070_s11 = smov (!%p250_p2), 64  }
   0xd   : > { %s1280_s28 = smov (!%p287_p3, %s932_s28), 15  ;;  %677 = vmatprep.subr.bf16.mxu1 %v1043_v8  ;;  %v577_v61 = vld [vmem:[%s1277_s6] sm:$0x3]  ;;  %vm850_vm3 = vcmask 523264  }
   0xe   : > { %s933_s12 = sshll.u32 %s1280_s28, 2  ;;  %v585_v60 = vsub.s32 0, %v584_v59  ;;  %v589_v62 = vsub.s32 1, %v584_v59 }
   0xf   : > { %s296_s17 = scalar_lea.vmem %s1272_s1, %s933_s12  ;;  %s1153_s27 = scalar_lea.vmem %s1271_s0, %s933_s12 }
  0x10   : > { %v1027_v9 = vld [vmem:[%s296_s17] sm:$0xff]   ;;  %v1029_v10 = vld [vmem:[%s296_s17 + $0x8] sm:$0xff]   ;;  %v1030_v11 = vld [vmem:[%s296_s17 + $0x10] sm:$0xff]   ;;  %678 = vmatpush1.bf16.msra.mxu1 %v1045_v12  ;;  %v586_v63 = vrot.slane %v577_v61, %v585_v60  ;;  %v590_v0 = vrot.slane %v577_v61, %v589_v62  ;;  %s937_s12 = sshll.u32 %s1280_s28, 3 }
  0x11   : > { %988 = vmatprep.mubr.msk.bf16.mxu0 %vm346_vm1, %v1027_v9  ;;  %v1032_v13 = vld [vmem:[%s296_s17 + $0x18] sm:$0xff]   ;;  %v1033_v14 = vld [vmem:[%s1153_s27] sm:$0xff]   ;;  %679 = vmatprep.subr.bf16.mxu1 %v1046_v15  ;;  %v1034_v20 = vld [vmem:[%s1153_s27 + $0x8] sm:$0xff]   ;;  %s1248_s15 = scalar_lea.vmem %s1278_s7, %s937_s12 }
  0x12   : > { %989 = vmatmul.mubr.msk.bf16.vlgmr.msra.gmra.mrb[0].mxu0 %vm346_vm1, %v1029_v10  ;;  %v1035_v22 = vld [vmem:[%s1153_s27 + $0x10] sm:$0xff]   ;;  %v1036_v23 = vld [vmem:[%s1153_s27 + $0x18] sm:$0xff]  }
  0x13   : > { %997 = vmatpush3.bf16.msra.mxu0 %v1028_v1  ;;  %992 = vmatprep.mubr.msk.bf16.mxu0 %vm346_vm1, %v1030_v11 }
  0x14   : > { %998 = vmatprep.subr.bf16.mxu0 %v1031_v6  ;;  %680 = vmatpush1.bf16.msra.mxu1 %v1048_v16 }
  0x15   : > { %681 = vmatprep.subr.bf16.mxu1 %v1049_v17 }
  0x17   : > { %999 = vmatpush3.bf16.msra.mxu0 %v1031_v6 }
  0x18   : > { %682 = vmatpush1.bf16.msra.mxu1 %v1051_v18 }
  0x19   : > { %683 = vmatprep.subr.bf16.mxu1 %v1052_v19 }
  0x1a   : > { %993 = vmatmul.mubr.msk.bf16.gmra.mrb[4].mxu0 %vm346_vm1, %v1032_v13 }
  0x1b   : > { %1000 = vmatprep.mubr.msk.bf16.mxu0 %vm460_vm2, %v1033_v14 }
  0x1c   : > { %684 = vmatpush1.bf16.msra.mxu1 %v1054_v21 }
  0x1d   : > { %685 = vmatprep.subr.bf16.mxu1 %v1055_v24 }
  0x20   : > { %686 = vmatpush1.bf16.msra.mxu1 %v1057_v25 }
  0x21   : > { %687 = vmatprep.subr.bf16.mxu1 %v1058_v26 }
  0x22   : > { %1001 = vmatmul.mubr.msk.bf16.vlgmr.msra.gmra.mrb[0].mxu0 %vm460_vm2, %v1034_v20 }
  0x23   : > { %1004 = vmatprep.mubr.msk.bf16.mxu0 %vm460_vm2, %v1035_v22 }
  0x24   : > { %688 = vmatpush1.bf16.msra.mxu1 %v1060_v27 }
  0x2a   : > { %1005 = vmatmul.mubr.msk.bf16.gmra.mrb[4].mxu0 %vm460_vm2, %v1036_v23 }
  0xf5   : > { %v1002_v30 = vpop.f32.mrb[0].mxu0 }
  0xf6   : > { %v547_v31 = vadd.f32 %v1002_v30, %v956_v29  ;;  %v507_v32 = vpop.f32.mrb[1].mxu0 }
  0xf7   : > { %v545_v33 = vadd.f32 %v956_v29, %v507_v32  ;;  %v1003_v34 = vpop.f32.mrb[2].mxu0 }
  0xf8   : > { %v548_v35 = vadd.f32 %v1003_v34, %v956_v29  ;;  %v510_v36 = vpop.f32.mrb[3].mxu0  ;;  %v555_v38 = vmax.f32 %v547_v31, 0.0 }
  0xf9   : > { %v546_v37 = vadd.f32 %v956_v29, %v510_v36  ;;  %v553_v40 = vmax.f32 %v545_v33, 0.0 }
  0xfa   : > { %v556_v39 = vmax.f32 %v548_v35, 0.0 }
  0xfb   : > { %v554_v41 = vmax.f32 %v546_v37, 0.0 }
  0xfc   : > { %v579_v42 = vpack.c.bf16 %v556_v39, %v555_v38 }
  0xfd   : > { %v578_v43 = vpack.c.bf16 %v554_v41, %v553_v40  ;;  %v1006_v44 = vpop.f32.mrb[4].mxu0 }
  0xfe   : > { %v551_v45 = vadd.f32 %v1006_v44, %v956_v29  ;;  %v523_v46 = vpop.f32.mrb[5].mxu0 }
  0xff   : > { %v549_v47 = vadd.f32 %v956_v29, %v523_v46  ;;  %v1007_v48 = vpop.f32.mrb[6].mxu0  ;;  %706 = vmatmul.mubr.bf16.vlgmr.msra.gmra.mrb[0].mxu1 %v578_v43 }
 0x100   : > { %v552_v49 = vadd.f32 %v1007_v48, %v956_v29  ;;  %v526_v50 = vpop.f32.mrb[7].mxu0  ;;  %715 = vmatprep.mubr.bf16.mxu1 %v1069_v28  ;;  %v559_v52 = vmax.f32 %v551_v45, 0.0 }
 0x101   : > { %v550_v51 = vadd.f32 %v956_v29, %v526_v50  ;;  %v557_v54 = vmax.f32 %v549_v47, 0.0 }
 0x102   : > { %v560_v53 = vmax.f32 %v552_v49, 0.0 }
 0x103   : > { %v558_v55 = vmax.f32 %v550_v51, 0.0 }
 0x104   : > { %v581_v56 = vpack.c.bf16 %v560_v53, %v559_v52 }
 0x105   : > { %v580_v57 = vpack.c.bf16 %v558_v55, %v557_v54 }
 0x107   : > { %716 = vmatmul.mubr.bf16.gmra.mrb[4].mxu1 %v579_v42 }
 0x108   : > { %725 = vmatprep.mubr.bf16.mxu1 %v1069_v28 }
 0x10f   : > { %726 = vmatmul.mubr.bf16.gmra.mrb[8].mxu1 %v580_v57 }
 0x110   : > { %735 = vmatprep.mubr.bf16.mxu1 %v1069_v28 }
 0x117   : > { %736 = vmatmul.mubr.bf16.gmra.mrb[12].mxu1 %v581_v56 }
 0x1d2   : > { %v707_v1 = vpop.f32.mrb[0].mxu1 }
 0x1d3   : > { %v1205_v2 = vadd.f32 %v707_v1, %v586_v63  ;;  %v709_v3 = vpop.f32.mrb[1].mxu1 }
 0x1d4   : > { %v711_v4 = vpop.f32.mrb[2].mxu1  ;;  %v1208_v6 = vadd.f32 %v709_v3, %v590_v0 }
 0x1d5   : > { %v746_v5 = vmax.f32 %v1205_v2, 0.0  ;;  %v713_v7 = vpop.f32.mrb[3].mxu1  ;;  %v1215_v11 = vadd.f32 %v711_v4, %v586_v63 }
 0x1d6   : > { %v1210_v8 = vadd.f32 %v713_v7, %v590_v0  ;;  %v747_v10 = vmax.f32 %v1208_v6, 0.0 }
 0x1d7   : > { %770 = vrot.lane.b32.xlu0 %v746_v5, %s1070_s11  ;;  %v748_v16 = vmax.f32 %v1215_v11, 0.0 }
 0x1d8   : > { %v749_v9 = vmax.f32 %v1210_v8, 0.0 }
 0x1da   : > { %v717_v12 = vpop.f32.mrb[4].mxu1  ;;  %820 = vrot.lane.b32.xlu1 %v749_v9, %s1070_s11 }
 0x1db   : > { %v1220_v13 = vadd.f32 %v717_v12, %v586_v63  ;;  %v719_v14 = vpop.f32.mrb[5].mxu1  ;;  %818 = vrot.lane.b32.xlu0 %v747_v10, %s1070_s11 }
 0x1dc   : > { %v721_v15 = vpop.f32.mrb[6].mxu1  ;;  %v720_v18 = vadd.f32 %v719_v14, %v590_v0 }
 0x1dd   : > { %v750_v17 = vmax.f32 %v1220_v13, 0.0  ;;  %v1225_v19 = vadd.f32 %v721_v15, %v586_v63  ;;  %v723_v20 = vpop.f32.mrb[7].mxu1 }
 0x1de   : > { %v751_v21 = vmax.f32 %v720_v18, 0.0  ;;  %v724_v23 = vadd.f32 %v723_v20, %v590_v0 }
 0x1df   : > { %774 = vrot.lane.b32.xlu1 %v750_v17, %s1070_s11  ;;  %772 = vrot.lane.b32.xlu0 %v748_v16, %s1070_s11  ;;  %v752_v22 = vmax.f32 %v1225_v19, 0.0 }
 0x1e0   : > { %v753_v28 = vmax.f32 %v724_v23, 0.0 }
 0x1e2   : > { %v727_v24 = vpop.f32.mrb[8].mxu1 }
 0x1e3   : > { %v1230_v25 = vadd.f32 %v727_v24, %v586_v63  ;;  %776 = vrot.lane.b32.xlu1 %v752_v22, %s1070_s11  ;;  %822 = vrot.lane.b32.xlu0 %v751_v21, %s1070_s11  ;;  %v729_v26 = vpop.f32.mrb[9].mxu1 }
 0x1e4   : > { %v731_v27 = vpop.f32.mrb[10].mxu1  ;;  %v730_v30 = vadd.f32 %v729_v26, %v590_v0 }
 0x1e5   : > { %v754_v29 = vmax.f32 %v1230_v25, 0.0  ;;  %v732_v31 = vadd.f32 %v731_v27, %v586_v63  ;;  %v733_v32 = vpop.f32.mrb[11].mxu1 }
 0x1e6   : > { %v755_v33 = vmax.f32 %v730_v30, 0.0  ;;  %v734_v35 = vadd.f32 %v733_v32, %v590_v0 }
 0x1e7   : > { %824 = vrot.lane.b32.xlu1 %v753_v28, %s1070_s11  ;;  %778 = vrot.lane.b32.xlu0 %v754_v29, %s1070_s11  ;;  %v756_v34 = vmax.f32 %v732_v31, 0.0 }
 0x1e8   : > { %v757_v40 = vmax.f32 %v734_v35, 0.0 }
 0x1ea   : > { %v737_v36 = vpop.f32.mrb[12].mxu1 }
 0x1eb   : > { %v738_v37 = vadd.f32 %v737_v36, %v586_v63  ;;  %v739_v38 = vpop.f32.mrb[13].mxu1  ;;  %780 = vrot.lane.b32.xlu1 %v756_v34, %s1070_s11  ;;  %826 = vrot.lane.b32.xlu0 %v755_v33, %s1070_s11 }
 0x1ec   : > { %v741_v39 = vpop.f32.mrb[14].mxu1  ;;  %v740_v42 = vadd.f32 %v739_v38, %v590_v0 }
 0x1ed   : > { %v758_v41 = vmax.f32 %v738_v37, 0.0  ;;  %v742_v43 = vadd.f32 %v741_v39, %v586_v63  ;;  %v743_v44 = vpop.f32.mrb[15].mxu1 }
 0x1ee   : > { %v759_v45 = vmax.f32 %v740_v42, 0.0  ;;  %v744_v47 = vadd.f32 %v743_v44, %v590_v0 }
 0x1ef   : > { %828 = vrot.lane.b32.xlu1 %v757_v40, %s1070_s11  ;;  %782 = vrot.lane.b32.xlu0 %v758_v41, %s1070_s11  ;;  %v760_v46 = vmax.f32 %v742_v43, 0.0 }
 0x1f0   : > { %v761_v48 = vmax.f32 %v744_v47, 0.0 }
 0x1f3   : > { %784 = vrot.lane.b32.xlu1 %v760_v46, %s1070_s11  ;;  %830 = vrot.lane.b32.xlu0 %v759_v45, %s1070_s11 }
 0x1f7   : > { %832 = vrot.lane.b32.xlu1 %v761_v48, %s1070_s11 }
 0x249   : > { %v771_v49 = vpop.permute.xlu0 %770 }
 0x24a   : > { %v794_v50 = vmax.f32 %v746_v5, %v771_v49 }
 0x24c   : > { %v821_v51 = vpop.permute.xlu1 %820  ;;  %v802_v52 = vmax.f32 %v794_v50, %v747_v10 }
 0x24d   : > { %v819_v53 = vpop.permute.xlu0 %818 }
 0x24e   : > { %v842_v54 = vmax.f32 %v802_v52, %v819_v53 }
 0x250   : > { %851 = vst.msk [vmem:[%s1248_s15] sm:$0xff] %vm850_vm3, %v842_v54 }
 0x251   : > { %v775_v55 = vpop.permute.xlu1 %774  ;;  %v773_v56 = vpop.permute.xlu0 %772 }
 0x252   : > { %v796_v57 = vmax.f32 %v750_v17, %v775_v55  ;;  %v795_v58 = vmax.f32 %v748_v16, %v773_v56 }
 0x254   : > { %v803_v59 = vmax.f32 %v795_v58, %v749_v9  ;;  %v804_v60 = vmax.f32 %v796_v57, %v751_v21 }
 0x255   : > { %v777_v61 = vpop.permute.xlu1 %776  ;;  %v823_v62 = vpop.permute.xlu0 %822 }
 0x256   : > { %v843_v63 = vmax.f32 %v803_v59, %v821_v51  ;;  %v797_v0 = vmax.f32 %v752_v22, %v777_v61  ;;  %v844_v1 = vmax.f32 %v804_v60, %v823_v62 }
 0x258   : > { %852 = vst.msk [vmem:[%s1248_s15 + $0x8] sm:$0xff] %vm850_vm3, %v843_v63  ;;  %853 = vst.msk [vmem:[%s1248_s15 + $0x10] sm:$0xff] %vm850_vm3, %v844_v1  ;;  %v805_v2 = vmax.f32 %v797_v0, %v753_v28 }
 0x259   : > { %v825_v3 = vpop.permute.xlu1 %824  ;;  %v779_v4 = vpop.permute.xlu0 %778 }
 0x25a   : > { %v845_v5 = vmax.f32 %v805_v2, %v825_v3  ;;  %v798_v6 = vmax.f32 %v754_v29, %v779_v4 }
 0x25c   : > { %854 = vst.msk [vmem:[%s1248_s15 + $0x18] sm:$0xff] %vm850_vm3, %v845_v5  ;;  %v806_v7 = vmax.f32 %v798_v6, %v755_v33 }
 0x25d   : > { %v781_v8 = vpop.permute.xlu1 %780  ;;  %v827_v9 = vpop.permute.xlu0 %826 }
 0x25e   : > { %v799_v10 = vmax.f32 %v756_v34, %v781_v8  ;;  %v846_v11 = vmax.f32 %v806_v7, %v827_v9 }
 0x260   : > { %855 = vst.msk [vmem:[%s1248_s15 + $0x20] sm:$0xff] %vm850_vm3, %v846_v11  ;;  %v807_v12 = vmax.f32 %v799_v10, %v757_v40 }
 0x261   : > { %v829_v13 = vpop.permute.xlu1 %828  ;;  %v783_v14 = vpop.permute.xlu0 %782 }
 0x262   : > { %v847_v15 = vmax.f32 %v807_v12, %v829_v13  ;;  %v800_v16 = vmax.f32 %v758_v41, %v783_v14 }
 0x264   : > { %856 = vst.msk [vmem:[%s1248_s15 + $0x28] sm:$0xff] %vm850_vm3, %v847_v15  ;;  %v808_v17 = vmax.f32 %v800_v16, %v759_v45 }
 0x265   : > { %v785_v18 = vpop.permute.xlu1 %784  ;;  %v831_v19 = vpop.permute.xlu0 %830 }
 0x266   : > { %v801_v20 = vmax.f32 %v760_v46, %v785_v18  ;;  %v848_v21 = vmax.f32 %v808_v17, %v831_v19 }
 0x268   : > { %857 = vst.msk [vmem:[%s1248_s15 + $0x30] sm:$0xff] %vm850_vm3, %v848_v21  ;;  %v809_v22 = vmax.f32 %v801_v20, %v761_v48 }
 0x269   : > { %v833_v23 = vpop.permute.xlu1 %832 }
 0x26a   : > { %v849_v24 = vmax.f32 %v809_v22, %v833_v23 }
 0x26c   : > { %858 = vst.msk [vmem:[%s1248_s15 + $0x38] sm:$0xff] %vm850_vm3, %v849_v24 }
 0x26d PF: > { %s17_s24 = sadd.s32 1, %s1067_s24  }
 0x26e   : > { %p14_p4 = scmp.ge.s32.totalorder %s17_s24, 4  }
 0x270   :  { %16 = sbr.rel (!%p14_p4) target bundleno = 1 (0x1), region = 81 }

</bundles_post_ra>
